<compile_context>
chip_gen: v6e
topology: v6e:2x2x1
jax: 0.10.0
libtpu: 0.0.40
codegen_flags: <defaults>
</compile_context>

<pallas_src>
import functools

import jax
import jax.numpy as jnp
from jax.experimental import pallas as pl
from jax.experimental.pallas import tpu as pltpu


def _round_up(x, m):
    return (x + m - 1) // m * m


def _actor_kernel(state_ref, w1_ref, b1_ref, w2_ref, b2_ref, w3_ref, b3_ref,
                  pe_ref, out_ref, *, n_rec, num_products):
    """One batch tile of the Actor forward pass.

    state_ref : (TB, input_shape)            matmul dtype (bf16 or f32)
    w*_ref    : (in, out)                    matmul dtype
    b*_ref    : (1, out)                     float32
    pe_ref    : (P_PAD, AE_PAD)              zero-padded product embedding, matmul dtype
    out_ref   : (1, n_rec, TB) int32         lane-dense argmax output (batch on lanes)
    """
    mm_dtype = w1_ref.dtype
    p_pad, ae_pad = pe_ref.shape

    x = state_ref[...]

    # fc1 -> relu  (matmul operands in mm_dtype, bias + relu in f32)
    h1 = jnp.maximum(
        jnp.dot(x, w1_ref[...], preferred_element_type=jnp.float32) + b1_ref[...],
        0.0)
    # fc2 -> relu
    h2 = jnp.maximum(
        jnp.dot(h1.astype(mm_dtype), w2_ref[...],
                preferred_element_type=jnp.float32) + b2_ref[...],
        0.0)
    # fc3 -> relu : (TB, n_rec * AE_PAD); padded columns are exactly 0 (zero W/b cols)
    h3 = jnp.maximum(
        jnp.dot(h2.astype(mm_dtype), w3_ref[...],
                preferred_element_type=jnp.float32) + b3_ref[...],
        0.0)

    tb = h3.shape[0]
    pe = pe_ref[...]

    # Loop-invariant argmax helpers, hoisted out of the n_rec loop (JAX does not
    # CSE broadcast_in_dim, so building these per slot would redo the work).
    prod_idx = jax.lax.broadcasted_iota(jnp.int32, (p_pad, tb), 0)
    if num_products < p_pad:
        # Additive 0 / -inf bias so padded product rows can never win the argmax.
        pad_bias = jnp.where(prod_idx < num_products, 0.0, -jnp.inf).astype(jnp.float32)
    else:
        pad_bias = None

    for r in range(n_rec):  # n_rec is a tiny static int (default 1); unrolled
        # 128-aligned slice -> zero-cost view of this recommendation slot's weights
        w_r = h3[:, r * ae_pad:(r + 1) * ae_pad].astype(mm_dtype)        # (TB, AE_PAD)

        # scores_t[p, b] = <pe[p, :], w_r[b, :]>  -> (P_PAD, TB)
        # Both operands contract their last (lane) dim: the standard Q @ K^T
        # feed (same dimension_numbers as the pallas flash-attention kernel),
        # lowered as an MXU matmul with transpose_rhs -- no XLU transpose.
        scores_t = jax.lax.dot_general(
            pe, w_r,
            dimension_numbers=(((1,), (1,)), ((), ())),
            preferred_element_type=jnp.float32)
        if pad_bias is not None:
            scores_t = scores_t + pad_bias

        # First-index argmax over the product (sublane) axis -> lane-dense (1, TB).
        # Assumes finite scores (NaN would fall through to the sentinel), which
        # holds here: relu outputs times finite embeddings.
        max_val = jnp.max(scores_t, axis=0, keepdims=True)
        amax_r = jnp.min(jnp.where(scores_t >= max_val, prod_idx, p_pad),
                         axis=0, keepdims=True)                           # (1, TB) int32
        # Direct row write (no concat / relayout of an (n_rec, TB) stack).
        out_ref[:, r:r + 1, :] = amax_r[None].astype(jnp.int32)


def actor_forward(state, params, prod_embed, *, n_rec, after_embed,
                  matmul_dtype=jnp.bfloat16, batch_block=1024):
    """Runs the Actor forward pass in a single fused Pallas TPU kernel."""
    w1, b1, w2, b2, w3, b3 = params
    B, input_shape = state.shape
    num_products = prod_embed.shape[0]
    no_fc2 = w3.shape[0]

    # ---- wrapper-side layout plumbing (trace-time only) ----
    ae_pad = _round_up(after_embed, 128)   # 128-lane-aligned per-slot blocks of h3
    p_pad = _round_up(num_products, 16)    # sublane minimum covering f32(8)/bf16(16)

    # Pad fc3 columns so each recommendation slot occupies a 128-lane-aligned block
    # (padded columns get zero weight & bias -> relu output exactly 0 there).
    w3p = jnp.zeros((no_fc2, n_rec * ae_pad), jnp.float32)
    b3p = jnp.zeros((1, n_rec * ae_pad), jnp.float32)
    for r in range(n_rec):
        w3p = w3p.at[:, r * ae_pad:r * ae_pad + after_embed].set(
            w3[:, r * after_embed:(r + 1) * after_embed])
        b3p = b3p.at[:, r * ae_pad:r * ae_pad + after_embed].set(
            b3[:, r * after_embed:(r + 1) * after_embed])

    # Zero-pad product embedding; padded product rows are masked to -inf in-kernel.
    pep = jnp.zeros((p_pad, ae_pad), jnp.float32)
    pep = pep.at[:num_products, :after_embed].set(prod_embed)

    # Batch tiling: keep >= 2 tiles whenever the batch allows it so the
    # "parallel" grid axis actually splits across v7x's two TensorCores; tiles
    # are 128-aligned (lane-dense output stores) once the batch is big enough.
    half = -(-B // 2)
    align = 128 if half >= 128 else 8
    tb = min(batch_block, _round_up(half, align))
    b_pad = _round_up(B, tb)
    num_tiles = b_pad // tb
    state_p = jnp.zeros((b_pad, input_shape), jnp.float32).at[:B].set(state)

    # Matmul operands in matmul_dtype (bf16 default: the MXU is bf16-native on
    # v5e/v6e/v7x and f32 operands decompose into ~3x bf16 passes; bf16 also
    # halves the state DMA).  Biases / ReLU / argmax stay in f32 (v5e VPU has
    # no bf16 arithmetic; the in-kernel .astype casts are cheap pack ops).
    state_p = state_p.astype(matmul_dtype)
    w1c = w1.astype(matmul_dtype)
    w2c = w2.astype(matmul_dtype)
    w3c = w3p.astype(matmul_dtype)
    pec = pep.astype(matmul_dtype)
    b1c = b1.astype(jnp.float32)
    b2c = b2.astype(jnp.float32)
    b3c = b3p.astype(jnp.float32)

    kernel = functools.partial(_actor_kernel, n_rec=n_rec, num_products=num_products)

    def replicated(shape):
        return pl.BlockSpec(shape, lambda i, _n=len(shape): (0,) * _n)

    out = pl.pallas_call(
        kernel,
        out_shape=jax.ShapeDtypeStruct((num_tiles, n_rec, tb), jnp.int32),
        grid=(num_tiles,),
        in_specs=[
            pl.BlockSpec((tb, input_shape), lambda i: (i, 0)),
            replicated(w1c.shape), replicated(b1c.shape),
            replicated(w2c.shape), replicated(b2c.shape),
            replicated(w3c.shape), replicated(b3c.shape),
            replicated(pec.shape),
        ],
        out_specs=pl.BlockSpec((1, n_rec, tb), lambda i: (i, 0, 0)),
        compiler_params=pltpu.CompilerParams(dimension_semantics=("parallel",)),
    )(state_p, w1c, b1c, w2c, b2c, w3c, b3c, pec)

    # (num_tiles, n_rec, TB) -> (B, n_rec)
    out = jnp.transpose(out, (0, 2, 1)).reshape(b_pad, n_rec)
    return out[:B]


def make_params(key, input_shape, n_rec, after_embed):
    """Deterministic synthetic parameters with the shapes nn.Linear implies."""
    no_fc1 = input_shape * 4
    no_fc2 = 2 * no_fc1
    out3 = n_rec * after_embed
    ks = jax.random.split(key, 6)
    w1 = jax.random.normal(ks[0], (input_shape, no_fc1), jnp.float32) * 0.3
    b1 = jax.random.normal(ks[1], (1, no_fc1), jnp.float32) * 0.1
    w2 = jax.random.normal(ks[2], (no_fc1, no_fc2), jnp.float32) * 0.3
    b2 = jax.random.normal(ks[3], (1, no_fc2), jnp.float32) * 0.1
    w3 = jax.random.normal(ks[4], (no_fc2, out3), jnp.float32) * 0.3
    b3 = jax.random.normal(ks[5], (1, out3), jnp.float32) * 0.1
    return (w1, b1, w2, b2, w3, b3)


def actor_reference(state, params, prod_embed, *, n_rec, after_embed):
    """Pure-JAX reference mirroring the PyTorch forward exactly (f32)."""
    w1, b1, w2, b2, w3, b3 = params
    x = jax.nn.relu(state @ w1 + b1)
    x = jax.nn.relu(x @ w2 + b2)
    x = jax.nn.relu(x @ w3 + b3)
    the_weights = x.reshape(-1, n_rec, after_embed)
    product_trans = prod_embed.T
    scores = jnp.matmul(the_weights, product_trans)
    return jnp.argmax(scores, axis=2).astype(jnp.int32)


if __name__ == "__main__":
    INPUT_SHAPE = 7      # module default
    N_REC = 1            # module default
    AFTER_EMBED = 30     # module default
    BATCH = 4
    NUM_PRODUCTS = 12

    key = jax.random.PRNGKey(0)
    k_state, k_pe, k_params = jax.random.split(key, 3)

    state = jax.random.normal(k_state, (BATCH, INPUT_SHAPE), jnp.float32)
    prod_embed = jax.random.normal(k_pe, (NUM_PRODUCTS, AFTER_EMBED), jnp.float32)
    params = make_params(k_params, INPUT_SHAPE, N_REC, AFTER_EMBED)

    # f32 path: must match the pure-JAX (torch-semantics) reference exactly.
    out = actor_forward(state, params, prod_embed, n_rec=N_REC,
                        after_embed=AFTER_EMBED, matmul_dtype=jnp.float32)
    out = jax.block_until_ready(out)
    ref = actor_reference(state, params, prod_embed, n_rec=N_REC, after_embed=AFTER_EMBED)
    assert out.shape == (BATCH, N_REC), out.shape
    assert jnp.array_equal(out, ref), (out, ref)

    # Multi-recommendation path (n_rec=2) with a non-multiple-of-8 batch, f32, exact.
    N_REC2, BATCH2 = 2, 5
    k_s2, k_p2 = jax.random.split(jax.random.PRNGKey(1))
    state2 = jax.random.normal(k_s2, (BATCH2, INPUT_SHAPE), jnp.float32)
    params2 = make_params(k_p2, INPUT_SHAPE, N_REC2, AFTER_EMBED)
    out2 = actor_forward(state2, params2, prod_embed, n_rec=N_REC2,
                         after_embed=AFTER_EMBED, matmul_dtype=jnp.float32)
    out2 = jax.block_until_ready(out2)
    ref2 = actor_reference(state2, params2, prod_embed, n_rec=N_REC2, after_embed=AFTER_EMBED)
    assert out2.shape == (BATCH2, N_REC2), out2.shape
    assert jnp.array_equal(out2, ref2), (out2, ref2)

    # Multi-tile path (batch split across two grid steps / two v7x TCs), f32, exact.
    BATCH3 = 300
    state3 = jax.random.normal(jax.random.PRNGKey(2), (BATCH3, INPUT_SHAPE), jnp.float32)
    out3 = actor_forward(state3, params, prod_embed, n_rec=N_REC,
                         after_embed=AFTER_EMBED, matmul_dtype=jnp.float32)
    out3 = jax.block_until_ready(out3)
    ref3 = actor_reference(state3, params, prod_embed, n_rec=N_REC, after_embed=AFTER_EMBED)
    assert out3.shape == (BATCH3, N_REC), out3.shape
    assert jnp.array_equal(out3, ref3), "multi-tile mismatch"

    # Default bf16 matmul-operand path (all generations): runs and yields valid
    # indices; near-tied scores may differ from the f32 reference by design.
    out_bf16 = actor_forward(state, params, prod_embed, n_rec=N_REC,
                             after_embed=AFTER_EMBED)
    out_bf16 = jax.block_until_ready(out_bf16)
    assert out_bf16.shape == (BATCH, N_REC)
    assert bool(jnp.all((out_bf16 >= 0) & (out_bf16 < NUM_PRODUCTS)))

    print("KERNEL_OK")
</pallas_src>

<mosaic_0001>
module attributes {stable_mosaic.version = 11 : i64} {
  func.func @_actor_kernel(%arg0: i32, %arg1: memref<8x7xf32, #tpu.memory_space<vmem>>, %arg2: memref<7x28xf32, #tpu.memory_space<vmem>>, %arg3: memref<1x28xf32, #tpu.memory_space<vmem>>, %arg4: memref<28x56xf32, #tpu.memory_space<vmem>>, %arg5: memref<1x56xf32, #tpu.memory_space<vmem>>, %arg6: memref<56x128xf32, #tpu.memory_space<vmem>>, %arg7: memref<1x128xf32, #tpu.memory_space<vmem>>, %arg8: memref<16x128xf32, #tpu.memory_space<vmem>>, %arg9: memref<1x1x8xi32, #tpu.memory_space<vmem>>) attributes {dimension_semantics = [#tpu.dimension_semantics<parallel>], iteration_bounds = array<i64: 1>, scalar_prefetch = 0 : i64, scratch_operands = 0 : i64, tpu.core_type = #tpu.core_type<tc>, window_params = [{transform_indices = @transform_0, window_bounds = array<i64: 8, 7>}, {pipeline_mode = #tpu.pipeline_mode<synchronous>, transform_indices = @transform_1, window_bounds = array<i64: 7, 28>}, {pipeline_mode = #tpu.pipeline_mode<synchronous>, transform_indices = @transform_2, window_bounds = array<i64: 1, 28>}, {pipeline_mode = #tpu.pipeline_mode<synchronous>, transform_indices = @transform_3, window_bounds = array<i64: 28, 56>}, {pipeline_mode = #tpu.pipeline_mode<synchronous>, transform_indices = @transform_4, window_bounds = array<i64: 1, 56>}, {pipeline_mode = #tpu.pipeline_mode<synchronous>, transform_indices = @transform_5, window_bounds = array<i64: 56, 128>}, {pipeline_mode = #tpu.pipeline_mode<synchronous>, transform_indices = @transform_6, window_bounds = array<i64: 1, 128>}, {pipeline_mode = #tpu.pipeline_mode<synchronous>, transform_indices = @transform_7, window_bounds = array<i64: 16, 128>}, {transform_indices = @transform_8, window_bounds = array<i64: 1, 1, 8>}]} {
    %c0 = arith.constant 0 : index
    %c0_0 = arith.constant 0 : index
    %0 = vector.load %arg1[%c0, %c0_0] : memref<8x7xf32, #tpu.memory_space<vmem>>, vector<8x7xf32>
    %c0_1 = arith.constant 0 : index
    %c0_2 = arith.constant 0 : index
    %1 = vector.load %arg2[%c0_1, %c0_2] : memref<7x28xf32, #tpu.memory_space<vmem>>, vector<7x28xf32>
    %cst = arith.constant dense<0.000000e+00> : vector<8x28xf32>
    %2 = tpu.matmul %0, %1, %cst {dimension_numbers = #tpu.dot_dimension_numbers<[1], [0], [0], [1], [0, 0, 1, 1], [], []>} : vector<8x7xf32>, vector<7x28xf32>, vector<8x28xf32> -> vector<8x28xf32>
    %c0_3 = arith.constant 0 : index
    %c0_4 = arith.constant 0 : index
    %3 = vector.load %arg3[%c0_3, %c0_4] : memref<1x28xf32, #tpu.memory_space<vmem>>, vector<1x28xf32>
    %4 = vector.broadcast %3 : vector<1x28xf32> to vector<8x28xf32>
    %5 = arith.addf %2, %4 : vector<8x28xf32>
    %cst_5 = arith.constant 0.000000e+00 : f32
    %6 = vector.broadcast %cst_5 : f32 to vector<8x28xf32>
    %7 = arith.maximumf %5, %6 : vector<8x28xf32>
    %c0_6 = arith.constant 0 : index
    %c0_7 = arith.constant 0 : index
    %8 = vector.load %arg4[%c0_6, %c0_7] : memref<28x56xf32, #tpu.memory_space<vmem>>, vector<28x56xf32>
    %cst_8 = arith.constant dense<0.000000e+00> : vector<8x56xf32>
    %9 = tpu.matmul %7, %8, %cst_8 {dimension_numbers = #tpu.dot_dimension_numbers<[1], [0], [0], [1], [0, 0, 1, 1], [], []>} : vector<8x28xf32>, vector<28x56xf32>, vector<8x56xf32> -> vector<8x56xf32>
    %c0_9 = arith.constant 0 : index
    %c0_10 = arith.constant 0 : index
    %10 = vector.load %arg5[%c0_9, %c0_10] : memref<1x56xf32, #tpu.memory_space<vmem>>, vector<1x56xf32>
    %11 = vector.broadcast %10 : vector<1x56xf32> to vector<8x56xf32>
    %12 = arith.addf %9, %11 : vector<8x56xf32>
    %cst_11 = arith.constant 0.000000e+00 : f32
    %13 = vector.broadcast %cst_11 : f32 to vector<8x56xf32>
    %14 = arith.maximumf %12, %13 : vector<8x56xf32>
    %c0_12 = arith.constant 0 : index
    %c0_13 = arith.constant 0 : index
    %15 = vector.load %arg6[%c0_12, %c0_13] : memref<56x128xf32, #tpu.memory_space<vmem>>, vector<56x128xf32>
    %cst_14 = arith.constant dense<0.000000e+00> : vector<8x128xf32>
    %16 = tpu.matmul %14, %15, %cst_14 {dimension_numbers = #tpu.dot_dimension_numbers<[1], [0], [0], [1], [0, 0, 1, 1], [], []>} : vector<8x56xf32>, vector<56x128xf32>, vector<8x128xf32> -> vector<8x128xf32>
    %c0_15 = arith.constant 0 : index
    %c0_16 = arith.constant 0 : index
    %17 = vector.load %arg7[%c0_15, %c0_16] : memref<1x128xf32, #tpu.memory_space<vmem>>, vector<1x128xf32>
    %18 = vector.broadcast %17 : vector<1x128xf32> to vector<8x128xf32>
    %19 = arith.addf %16, %18 : vector<8x128xf32>
    %cst_17 = arith.constant 0.000000e+00 : f32
    %20 = vector.broadcast %cst_17 : f32 to vector<8x128xf32>
    %21 = arith.maximumf %19, %20 : vector<8x128xf32>
    %c0_18 = arith.constant 0 : index
    %c0_19 = arith.constant 0 : index
    %22 = vector.load %arg8[%c0_18, %c0_19] : memref<16x128xf32, #tpu.memory_space<vmem>>, vector<16x128xf32>
    %23 = tpu.iota {dimensions = array<i32: 0>} : vector<16x8xi32>
    %c12_i32 = arith.constant 12 : i32
    %24 = vector.broadcast %c12_i32 : i32 to vector<16x8xi32>
    %25 = arith.cmpi slt, %23, %24 : vector<16x8xi32>
    %cst_20 = arith.constant 0.000000e+00 : f32
    %cst_21 = arith.constant 0xFF800000 : f32
    %26 = vector.broadcast %cst_20 : f32 to vector<16x8xf32>
    %27 = vector.broadcast %cst_21 : f32 to vector<16x8xf32>
    %28 = arith.select %25, %26, %27 : vector<16x8xi1>, vector<16x8xf32>
    %cst_22 = arith.constant dense<0.000000e+00> : vector<16x8xf32>
    %29 = tpu.matmul %22, %21, %cst_22 {dimension_numbers = #tpu.dot_dimension_numbers<[1], [1], [0], [0], [0, 0, 1, 0], [], []>} : vector<16x128xf32>, vector<8x128xf32>, vector<16x8xf32> -> vector<16x8xf32>
    %30 = arith.addf %29, %28 : vector<16x8xf32>
    %cst_23 = arith.constant dense<0xFF800000> : vector<8xf32>
    %31 = vector.multi_reduction <maximumf>, %30, %cst_23 [0] : vector<16x8xf32> to vector<8xf32>
    %32 = vector.shape_cast %31 : vector<8xf32> to vector<1x8xf32>
    %33 = vector.broadcast %32 : vector<1x8xf32> to vector<16x8xf32>
    %34 = arith.cmpf oge, %30, %33 : vector<16x8xf32>
    %c16_i32 = arith.constant 16 : i32
    %35 = vector.broadcast %c16_i32 : i32 to vector<16x8xi32>
    %36 = arith.select %34, %23, %35 : vector<16x8xi1>, vector<16x8xi32>
    %cst_24 = arith.constant dense<2147483647> : vector<8xi32>
    %37 = vector.multi_reduction <minsi>, %36, %cst_24 [0] : vector<16x8xi32> to vector<8xi32>
    %38 = vector.shape_cast %37 : vector<8xi32> to vector<1x8xi32>
    %39 = vector.shape_cast %38 : vector<1x8xi32> to vector<1x1x8xi32>
    %c0_25 = arith.constant 0 : index
    %c0_26 = arith.constant 0 : index
    %c0_27 = arith.constant 0 : index
    %40 = vector.load %arg9[%c0_25, %c0_26, %c0_27] : memref<1x1x8xi32, #tpu.memory_space<vmem>>, vector<1x1x8xi32>
    tpu.vector_store %arg9[%c0_25, %c0_26, %c0_27], %39 {strides = array<i32>} : memref<1x1x8xi32, #tpu.memory_space<vmem>>, vector<1x1x8xi32>,
    return
  }
  func.func @transform_0(%arg0: i32) -> (i32, i32) {
    %c0_i32 = arith.constant 0 : i32
    %c0_i32_0 = arith.constant 0 : i32
    return %arg0, %c0_i32 : i32, i32
  }
  func.func @transform_1(%arg0: i32) -> (i32, i32) {
    %c0_i32 = arith.constant 0 : i32
    %c0_i32_0 = arith.constant 0 : i32
    %c0_i32_1 = arith.constant 0 : i32
    return %c0_i32, %c0_i32_0 : i32, i32
  }
  func.func @transform_2(%arg0: i32) -> (i32, i32) {
    %c0_i32 = arith.constant 0 : i32
    %c0_i32_0 = arith.constant 0 : i32
    %c0_i32_1 = arith.constant 0 : i32
    return %c0_i32, %c0_i32_0 : i32, i32
  }
  func.func @transform_3(%arg0: i32) -> (i32, i32) {
    %c0_i32 = arith.constant 0 : i32
    %c0_i32_0 = arith.constant 0 : i32
    %c0_i32_1 = arith.constant 0 : i32
    return %c0_i32, %c0_i32_0 : i32, i32
  }
  func.func @transform_4(%arg0: i32) -> (i32, i32) {
    %c0_i32 = arith.constant 0 : i32
    %c0_i32_0 = arith.constant 0 : i32
    %c0_i32_1 = arith.constant 0 : i32
    return %c0_i32, %c0_i32_0 : i32, i32
  }
  func.func @transform_5(%arg0: i32) -> (i32, i32) {
    %c0_i32 = arith.constant 0 : i32
    %c0_i32_0 = arith.constant 0 : i32
    %c0_i32_1 = arith.constant 0 : i32
    return %c0_i32, %c0_i32_0 : i32, i32
  }
  func.func @transform_6(%arg0: i32) -> (i32, i32) {
    %c0_i32 = arith.constant 0 : i32
    %c0_i32_0 = arith.constant 0 : i32
    %c0_i32_1 = arith.constant 0 : i32
    return %c0_i32, %c0_i32_0 : i32, i32
  }
  func.func @transform_7(%arg0: i32) -> (i32, i32) {
    %c0_i32 = arith.constant 0 : i32
    %c0_i32_0 = arith.constant 0 : i32
    %c0_i32_1 = arith.constant 0 : i32
    return %c0_i32, %c0_i32_0 : i32, i32
  }
  func.func @transform_8(%arg0: i32) -> (i32, i32, i32) {
    %c0_i32 = arith.constant 0 : i32
    %c0_i32_0 = arith.constant 0 : i32
    %c0_i32_1 = arith.constant 0 : i32
    return %arg0, %c0_i32, %c0_i32_0 : i32, i32, i32
  }
}

</mosaic_0001>

<bundles_post_ra>
// kernel: tpu_custom_call.1
= control target key start
LH: loop header
LB: loop body
LE: loop exit
PB: predicated region body
PF: predicated region fallthrough
CT: control target
= control target key end

     0   :  { %13 = vsyncpa [#allocation3], 0  ;;  %s790_s0 = inlined_call_operand.hbm [shape: f32[8,7], index: 0, kind: input, shape index: {}]   ;;  %s791_s1 = inlined_call_operand.hbm [shape: f32[7,28], index: 1, kind: input, shape index: {}]   ;;  %s792_s2 = inlined_call_operand.vmem [shape: f32[1,28], index: 2, kind: input, shape index: {}]   ;;  %s793_s3 = inlined_call_operand.hbm [shape: f32[28,56], index: 3, kind: input, shape index: {}]   ;;  %s794_s4 = inlined_call_operand.vmem [shape: f32[1,56], index: 4, kind: input, shape index: {}]   ;;  %s795_s5 = inlined_call_operand.hbm [shape: f32[56,128], index: 5, kind: input, shape index: {}]   ;;  %s796_s6 = inlined_call_operand.vmem [shape: f32[1,128], index: 6, kind: input, shape index: {}]   ;;  %s797_s7 = inlined_call_operand.hbm [shape: f32[16,128], index: 7, kind: input, shape index: {}]   ;;  %s798_s8 = inlined_call_operand.hbm [shape: s32[1,1,8], index: 8, kind: output, shape index: {}]  }
   0x1   :  { %14 = vsyncpa [#allocation6], 0 }
   0x2   :  { %15 = vsyncpa [#allocation9], 0 }
   0x3   :  { %16 = vsyncpa [#allocation4], 0  ;;  %s694_s27 = smov [#allocation5]  }
   0x4   :  { %s33_s28 = sshll.u32 %s694_s27, 4  ;;  %s34_s28 = int_to_ptr.vmem [resolvable:$true] %s33_s28 }
   0x5   :  { %s574_s29 = scalar_lea.vmem %s34_s28, 128  ;;  %p579_p1 = scmp.lt.s32.totalorder %s34_s28, %s34_s28 }
   0x6   :  { %p575_p0 = scmp.ne.s32.totalorder %s34_s28, %s574_s29  ;;  %p580_p2 = scmp.lt.s32.totalorder %s574_s29, %s574_s29 }
   0x8   :  { %p581_p3 = por %p580_p2, %p579_p1 }
   0xa   :  { %p582_p4 = pnand %p581_p3, %p575_p0 }
   0xc   :  { %585 = shalt.err (!%p582_p4)
}
   0xd   :  { %36 = dma.hbm_to_vmem [thread:$0]  %s791_s1, 128, %s34_s28, [#allocation6]  }
   0xe   :  { %s695_s10 = smov [#allocation8]   ;;  %s696_s12 = smov [#allocation2]  }
   0xf   :  { %s58_s11 = sshll.u32 %s695_s10, 4  ;;  %s23_s13 = sshll.u32 %s696_s12, 4  ;;  %s59_s11 = int_to_ptr.vmem [resolvable:$true] %s58_s11  ;;  %s24_s13 = int_to_ptr.vmem [resolvable:$true] %s23_s13 }
  0x10   :  { %s594_s14 = scalar_lea.vmem %s59_s11, 896  ;;  %p599_p6 = scmp.lt.s32.totalorder %s59_s11, %s59_s11 }
  0x11   :  { %p595_p5 = scmp.ne.s32.totalorder %s59_s11, %s594_s14  ;;  %p600_p7 = scmp.lt.s32.totalorder %s594_s14, %s594_s14 }
  0x13   :  { %p601_p8 = por %p600_p7, %p599_p6 }
  0x15   :  { %p602_p9 = pnand %p601_p8, %p595_p5 }
  0x17   :  { %605 = shalt.err (!%p602_p9)
}
  0x18   :  { %s697_s15 = smov 128   ;;  %s698_s16 = smov 8  }
  0x19   :  { %64 = dma.hbm_to_vmem [thread:$0]  %s795_s5, 896, %s59_s11, [#allocation9], %s697_s15, %s697_s15, %s698_s16  }
  0x1a   :  { %s614_s1 = scalar_lea.vmem %s24_s13, 128  ;;  %p619_p11 = scmp.lt.s32.totalorder %s24_s13, %s24_s13 }
  0x1b   :  { %p615_p10 = scmp.ne.s32.totalorder %s24_s13, %s614_s1  ;;  %p620_p12 = scmp.lt.s32.totalorder %s614_s1, %s614_s1 }
  0x1d   :  { %p621_p13 = por %p620_p12, %p619_p11 }
  0x1f   :  { %p622_p0 = pnand %p621_p13, %p615_p10 }
  0x21   :  { %625 = shalt.err (!%p622_p0)
}
  0x22   :  { %26 = dma.hbm_to_vmem [thread:$0]  %s790_s0, 128, %s24_s13, [#allocation3]  }
  0x23   :  { %s699_s21 = smov [#allocation7]   ;;  %s700_s23 = smov [#allocation10]  }
  0x24   :  { %s44_s22 = sshll.u32 %s699_s21, 4  ;;  %s72_s24 = sshll.u32 %s700_s23, 4  ;;  %s45_s22 = int_to_ptr.vmem [resolvable:$true] %s44_s22  ;;  %s73_s24 = int_to_ptr.vmem [resolvable:$true] %s72_s24 }
  0x25   :  { %s634_s25 = scalar_lea.vmem %s45_s22, 512  ;;  %p639_p2 = scmp.lt.s32.totalorder %s45_s22, %s45_s22 }
  0x26   :  { %p635_p1 = scmp.ne.s32.totalorder %s45_s22, %s634_s25  ;;  %p640_p3 = scmp.lt.s32.totalorder %s634_s25, %s634_s25 }
  0x28   :  { %p641_p4 = por %p640_p3, %p639_p2 }
  0x2a   :  { %p642_p5 = pnand %p641_p4, %p635_p1 }
  0x2c   :  { %645 = shalt.err (!%p642_p5)
}
  0x2d   :  { %50 = dma.hbm_to_vmem [thread:$0]  %s793_s3, 512, %s45_s22, [#allocation6], %s697_s15, %s697_s15, %s698_s16  }
  0x2e   :  { %s654_s0 = scalar_lea.vmem %s73_s24, 256  ;;  %p659_p7 = scmp.lt.s32.totalorder %s73_s24, %s73_s24 }
  0x2f   :  { %p655_p6 = scmp.ne.s32.totalorder %s73_s24, %s654_s0  ;;  %p660_p8 = scmp.lt.s32.totalorder %s654_s0, %s654_s0 }
  0x31   :  { %p661_p9 = por %p660_p8, %p659_p7 }
  0x33   :  { %p662_p10 = pnand %p661_p9, %p655_p6 }
  0x35   :  { %665 = shalt.err (!%p662_p10)
}
  0x36   :  { %78 = dma.hbm_to_vmem [thread:$0]  %s797_s7, 256, %s73_s24, [#allocation9], %s697_s15, %s697_s15, %s698_s16  }
  0x37   :  { %686 = dma.done.wait [#allocation3], 128  }
  0x38   :  { %687 = vsyncadd [#allocation3], 4294967168 }
  0x39   :  { %688 = dma.done.wait [#allocation6], 640  }
  0x3a   :  { %689 = vsyncadd [#allocation6], 4294966656 }
  0x3b   :  { %690 = dma.done.wait [#allocation9], 1152  }
  0x3c   :  { %691 = vsyncadd [#allocation9], 4294966144  ;;  %v701_v0 = vmov 0.0   ;;  %vm702_vm0 = vmmov 0   ;;  %vm107_vm1 = vcmask 1046528   ;;  %vm103_vm2 = vcmask 56320  }
  0x3d   :  { %517 = vmatprep.subr.mxu1 %v701_v0  ;;  %519 = vmatprep.mubr.msk.f32.mxu1 %vm702_vm0, %v701_v0  ;;  %v95_v1 = vld [vmem:[#allocation5] sm:$0x7f]  ;;  %v94_v2 = vld [vmem:[#allocation2] sm:$0xff]  ;;  %vm197_vm3 = vcmask 1043456   ;;  %v183_v5 = vld [vmem:[#allocation7 + $0x8] sm:$0xff]  ;;  %vm193_vm4 = vcmask 228352   ;;  %v363_v31 = vlaneseq }
  0x3e   :  { %533 = vmatprep.subr.mxu0 %v701_v0  ;;  %547 = vmatprep.mubr.msk.f32.mxu0 %vm702_vm0, %v701_v0  ;;  %v185_v3 = vld [vmem:[#allocation7 + $0x18] sm:$0xf]  ;;  %v184_v4 = vld [vmem:[#allocation7 + $0x10] sm:$0xff]  ;;  %v182_v6 = vld [vmem:[#allocation7] sm:$0xff]  ;;  %vm286_vm5 = vcmask 457728   ;;  %v703_v34 = vmov -inf  }
  0x3f   :  { %518 = vmatpush3.msk.msra.mxu1 %vm107_vm1, %v95_v1  ;;  %v278_v7 = vld [vmem:[#allocation8 + $0x30] sm:$0xff]  ;;  %v277_v8 = vld [vmem:[#allocation8 + $0x28] sm:$0xff]  ;;  %v276_v9 = vld [vmem:[#allocation8 + $0x20] sm:$0xff]  ;;  %v364_v32 = vshrl.u32 %v363_v31, 7  ;;  %vm445_vm7 = vcmask 64512   ;;  %vm472_vm13 = vcmask 57344  }
  0x40   :  { %520 = vmatmul.mubr.msk.f32.vlgmr.msra.gmra.mxu1 %vm103_vm2, %v94_v2  ;;  %522 = vmatprep.subr.mxu1 %v701_v0  ;;  %v275_v10 = vld [vmem:[#allocation8 + $0x18] sm:$0xff]  ;;  %v491_v11 = vld [vmem:[%s792_s2] ss:$0 sm:$0xff]  ;;  %v273_v17 = vld [vmem:[#allocation8 + $0x8] sm:$0xff] }
  0x41   :  { %523 = vmatpush3.msk.msra.mxu1 %vm197_vm3, %v185_v3  ;;  %530 = vmatprep.mubr.msk.f32.mxu1 %vm702_vm0, %v701_v0  ;;  %v274_v16 = vld [vmem:[#allocation8 + $0x10] sm:$0xff]  ;;  %v272_v18 = vld [vmem:[#allocation8] sm:$0xff]  ;;  %v361_v24 = vld [vmem:[#allocation10] sm:$0xff]  ;;  %v365_v33 = vadd.s32 8, %v364_v32 }
  0x42   :  { %524 = vmatprep.subr.mxu1 %v701_v0  ;;  %534 = vmatpush3.msra.mxu0 %v278_v7  ;;  %v494_v19 = vld [vmem:[%s794_s4] ss:$0 sm:$0xff]  ;;  %v362_v30 = vld [vmem:[#allocation10 + $0x8] sm:$0xff]  ;;  %s704_s4 = smov [#allocation11]  }
  0x43   :  { %525 = vmatpush3.msra.mxu1 %v184_v4  ;;  %535 = vmatprep.subr.mxu0 %v701_v0  ;;  %v497_v25 = vld [vmem:[%s796_s6] ss:$0 sm:$0xff]  ;;  %vm367_vm6 = vcmp.lt.s32.totalorder %v365_v33, 12  ;;  %s480_s6 = sshll.u32 %s704_s4, 4  ;;  %s481_s6 = int_to_ptr.vmem [resolvable:$true] %s480_s6 }
  0x44   :  { %526 = vmatprep.subr.mxu1 %v701_v0  ;;  %536 = vmatpush3.msra.mxu0 %v277_v8  ;;  %v369_v35 = vsel %vm367_vm6, 0.0, %v703_v34  ;;  %s666_s10 = scalar_lea.vmem %s481_s6, 16  ;;  %s670_s11 = scalar_lea.vmem %s481_s6, 32 }
  0x45   :  { %527 = vmatpush3.msra.mxu1 %v183_v5  ;;  %537 = vmatprep.subr.mxu0 %v701_v0  ;;  %p667_p11 = scmp.ne.s32.totalorder %s481_s6, %s666_s10  ;;  %p671_p12 = scmp.lt.s32.totalorder %s481_s6, %s481_s6 }
  0x46   :  { %528 = vmatprep.subr.mxu1 %v701_v0  ;;  %538 = vmatpush3.msra.mxu0 %v276_v9  ;;  %p672_p13 = scmp.lt.s32.totalorder %s670_s11, %s666_s10 }
  0x47   :  { %529 = vmatpush3.msra.mxu1 %v182_v6  ;;  %539 = vmatprep.subr.mxu0 %v701_v0 }
  0x48   :  { %540 = vmatpush3.msra.mxu0 %v275_v10  ;;  %p673_p0 = por %p672_p13, %p671_p12 }
  0x49   :  { %541 = vmatprep.subr.mxu0 %v701_v0 }
  0x4a   :  { %542 = vmatpush3.msra.mxu0 %v274_v16  ;;  %p674_p1 = pnand %p673_p0, %p667_p11 }
  0x4b   :  { %543 = vmatprep.subr.mxu0 %v701_v0 }
  0x4c   :  { %544 = vmatpush3.msra.mxu0 %v273_v17 }
  0x4d   :  { %545 = vmatprep.subr.mxu0 %v701_v0 }
  0x4e   :  { %546 = vmatpush3.msra.mxu0 %v272_v18 }
 0x100   :  { %v177_v12 = vpop.f32.mrf.mxu1 }
 0x101   :  { %v178_v13 = vadd.f32 %v491_v11, %v177_v12 }
 0x102   :  { %v521_v14 = vpop.f32.mrf.mxu1 }
 0x103   :  { %v181_v15 = vmax.f32 %v178_v13, 0.0 }
 0x105   :  { %531 = vmatmul.mubr.msk.f32.vlgmr.msra.gmra.mxu1 %vm193_vm4, %v181_v15 }
 0x106   :  { %552 = vmatprep.mubr.f32.mxu1 %v361_v24 }
 0x1c5   :  { %v267_v20 = vpop.f32.mrf.mxu1 }
 0x1c6   :  { %v268_v21 = vadd.f32 %v494_v19, %v267_v20 }
 0x1c7   :  { %v532_v22 = vpop.f32.mrf.mxu1 }
 0x1c8   :  { %v271_v23 = vmax.f32 %v268_v21, 0.0 }
 0x1ca   :  { %548 = vmatmul.mubr.msk.f32.vlgmr.msra.gmra.mxu0 %vm286_vm5, %v271_v23 }
 0x28a   :  { %v356_v26 = vpop.f32.mrf.mxu0 }
 0x28b   :  { %v357_v27 = vadd.f32 %v497_v25, %v356_v26 }
 0x28c   :  { %v549_v28 = vpop.f32.mrf.mxu0 }
 0x28d   :  { %v360_v29 = vmax.f32 %v357_v27, 0.0 }
 0x28f   :  { %550 = vmatprep.subr.mxu1 %v360_v29 }
 0x290   :  { %551 = vmatpush3.xpose.msra.mxu1 %v360_v29 }
 0x293   :  { %553 = vmatmul.mubr.f32.vlgmr.msra.gmra.mxu1 %v362_v30 }
 0x353   :  { %v554_v36 = vpop.f32.mrf.mxu1 }
 0x354   :  { %v442_v37 = vadd.f32 %v554_v36, %v369_v35 }
 0x355   :  { %v436_v38 = vpop.f32.mrf.mxu1 }
 0x356   :  { %v446_v39 = vsel %vm445_vm7, %v436_v38, -inf  ;;  %v447_v40 = vsel %vm445_vm7, %v442_v37, -inf }
 0x357   :  { %v448_v41 = vmax.f32 %v446_v39, %v447_v40 }
 0x359   :  { %v449_v42 = vrot.slane %v448_v41, 4 }
 0x35b   :  { %v450_v43 = vmax.f32 %v448_v41, %v449_v42 }
 0x35d   :  { %v451_v44 = vrot.slane %v450_v43, 2 }
 0x35f   :  { %v452_v45 = vmax.f32 %v450_v43, %v451_v44 }
 0x361   :  { %v453_v46 = vrot.slane %v452_v45, 1 }
 0x363   :  { %v454_v47 = vmax.f32 %v452_v45, %v453_v46 }
 0x365   :  { %vm455_vm8 = vcmp.ge.f32.partialorder %v436_v38, %v454_v47  ;;  %vm456_vm9 = vcmp.ge.f32.partialorder %v442_v37, %v454_v47 }
 0x366   :  { %v457_v48 = vsel %vm455_vm8, %v364_v32, 16  ;;  %v458_v49 = vsel %vm456_vm9, %v365_v33, 16 }
 0x367   :  { %v459_v50 = vsel %vm445_vm7, %v457_v48, 2147483647  ;;  %v460_v51 = vsel %vm445_vm7, %v458_v49, 2147483647 }
 0x368   :  { %vm461_vm10 = vcmp.lt.s32.totalorder %v459_v50, %v460_v51 }
 0x369   :  { %v462_v52 = vsel %vm461_vm10, %v459_v50, %v460_v51 }
 0x36a   :  { %v463_v53 = vrot.slane %v462_v52, 4 }
 0x36c   :  { %vm464_vm11 = vcmp.lt.s32.totalorder %v462_v52, %v463_v53 }
 0x36d   :  { %v465_v54 = vsel %vm464_vm11, %v462_v52, %v463_v53 }
 0x36e   :  { %v466_v55 = vrot.slane %v465_v54, 2 }
 0x370   :  { %vm467_vm12 = vcmp.lt.s32.totalorder %v465_v54, %v466_v55 }
 0x371   :  { %v468_v56 = vsel %vm467_vm12, %v465_v54, %v466_v55 }
 0x372   :  { %v469_v57 = vrot.slane %v468_v56, 1 }
 0x374   :  { %vm470_vm14 = vcmp.lt.s32.totalorder %v468_v56, %v469_v57 }
 0x375   :  { %v471_v58 = vsel %vm470_vm14, %v468_v56, %v469_v57 }
 0x376   :  { %473 = vst.msk [vmem:[#allocation11] sm:$0x1] %vm472_vm13, %v471_v58 }
 0x377   :  { %677 = shalt.err (!%p674_p1)
}
 0x378   :  { %483 = dma.vmem_to_hbm [thread:$0]  %s481_s6, 16, %s798_s8, [#allocation4]  }
 0x379   :  { %692 = dma.done.wait [#allocation4], 16  }
 0x37a   :  { %693 = vsyncadd [#allocation4], 4294967280 }
 0x37b   :  { %487 = vsyncpa [#allocation3], 1 }
 0x37c   :  { %488 = vsyncpa [#allocation6], 1 }
 0x37d   :  { %489 = vsyncpa [#allocation9], 1 }
 0x37e   :  { %490 = vsyncpa [#allocation4], 1 }

</bundles_post_ra>
